<compile_context>
chip_gen: v6e
topology: v6e:2x2x1
jax: 0.10.0
libtpu: 0.0.40
codegen_flags: <defaults>
</compile_context>

<pallas_src>
import jax
import jax.numpy as jnp
from jax.experimental import pallas as pl
from jax.experimental.pallas import tpu as pltpu


_TAP_STRIDE = 8  # taps staged 8 sublanes apart (f32 native sublane tile)


def _make_basic_block_kernel(C, H, W):
    """Fused conv1+bn1+relu / conv2+bn2+add+relu kernel for one image."""
    HW = H * W
    # Halo staging offset: smallest multiple of 128 covering the largest
    # negative tap shift (W + 1), so stores into the staging buffer stay
    # lane-aligned; only the tap *loads* use (cheap, XLU-handled) offsets.
    off = ((W + 1 + 127) // 128) * 128
    bufw = off + HW + off
    offsets = [(dy, dx) for dy in (-1, 0, 1) for dx in (-1, 0, 1)]

    def kernel(x_ref, w1_ref, w2_ref, b1_ref, b2_ref, out_ref,
               xbuf_ref, tap_ref):
        # Zero scratch: keeps the halo region of xbuf and the unused
        # (zero-weight) rows of tap_ref at exactly 0.0.
        xbuf_ref[...] = jnp.zeros_like(xbuf_ref)
        tap_ref[...] = jnp.zeros_like(tap_ref)

        x = x_ref[0]                                   # (C, HW) f32
        xbuf_ref[:, off:off + HW] = x                  # lane-aligned store

        # Output-pixel column index (on the lane axis) -> masks for dx = +-1.
        col = jax.lax.broadcasted_iota(jnp.int32, (1, HW), 1) % W
        not_left_edge = col >= 1                       # valid taps for dx=-1
        not_right_edge = col <= W - 2                  # valid taps for dx=+1

        def conv3x3(w_ref, b_ref):
            # Stage the 9 shifted taps (each (C, HW)) and do the whole 3x3
            # conv as ONE (C, 9*8) x (9*8, HW) matmul on the MXU.
            for t, (dy, dx) in enumerate(offsets):
                start = off + dy * W + dx              # static lane offset
                tap = xbuf_ref[:, start:start + HW]    # (C, HW)
                if dx == -1:
                    tap = jnp.where(not_left_edge, tap, 0.0)
                elif dx == 1:
                    tap = jnp.where(not_right_edge, tap, 0.0)
                tap_ref[t * _TAP_STRIDE:t * _TAP_STRIDE + C, :] = tap
            acc = jnp.dot(w_ref[...], tap_ref[...],
                          preferred_element_type=jnp.float32)   # (C, HW)
            return acc + b_ref[...]                    # folded-BN bias

        # conv1 -> bn1 -> relu  (BN1 scale already folded into w1)
        y1 = jnp.maximum(conv3x3(w1_ref, b1_ref), 0.0)
        xbuf_ref[:, off:off + HW] = y1                 # restage for conv2

        # conv2 -> bn2 -> + identity -> relu  (BN2 scale folded into w2)
        y2 = conv3x3(w2_ref, b2_ref) + x
        out_ref[0] = jnp.maximum(y2, 0.0).astype(out_ref.dtype)

    return kernel, bufw


def _fold_bn(gamma, beta, mean, var, eps=1e-5):
    scale = gamma / jnp.sqrt(var + eps)
    bias = beta - mean * scale
    return scale, bias


def _fold_conv_weights(w_oihw, scale):
    """(Cout, Cin, 3, 3) torch weights + BN scale -> (Cout, 9*_TAP_STRIDE).

    Column layout matches the in-kernel tap staging: tap t = (dy+1)*3+(dx+1)
    occupies columns [t*_TAP_STRIDE, t*_TAP_STRIDE + Cin); the rest are 0."""
    Cout, Cin = w_oihw.shape[0], w_oihw.shape[1]
    w = jnp.transpose(w_oihw, (0, 2, 3, 1)).reshape(Cout, 9, Cin)
    w = w * scale[:, None, None]
    wz = jnp.zeros((Cout, 9, _TAP_STRIDE), jnp.float32)
    wz = wz.at[:, :, :Cin].set(w.astype(jnp.float32))
    return wz.reshape(Cout, 9 * _TAP_STRIDE)


@jax.jit
def basic_block_forward(x_nchw, params):
    """BasicBlock forward (stride=1, downsample=None). Input/output NCHW."""
    N, C, H, W = x_nchw.shape
    HW = H * W
    # NCHW is already (N, C, H*W) in memory -> free reshape, spatial on lanes.
    x = x_nchw.reshape(N, C, HW).astype(jnp.float32)

    s1, b1 = _fold_bn(params["g1"], params["b1"], params["m1"], params["v1"])
    s2, b2 = _fold_bn(params["g2"], params["b2"], params["m2"], params["v2"])
    w1 = _fold_conv_weights(params["w1"], s1)          # (C, 72)
    w2 = _fold_conv_weights(params["w2"], s2)
    b1 = b1.reshape(C, 1).astype(jnp.float32)
    b2 = b2.reshape(C, 1).astype(jnp.float32)

    kernel, bufw = _make_basic_block_kernel(C, H, W)

    out = pl.pallas_call(
        kernel,
        out_shape=jax.ShapeDtypeStruct((N, C, HW), jnp.float32),
        grid=(N,),
        in_specs=[
            pl.BlockSpec((1, C, HW), lambda n: (n, 0, 0)),
            pl.BlockSpec((C, 9 * _TAP_STRIDE), lambda n: (0, 0)),
            pl.BlockSpec((C, 9 * _TAP_STRIDE), lambda n: (0, 0)),
            pl.BlockSpec((C, 1), lambda n: (0, 0)),
            pl.BlockSpec((C, 1), lambda n: (0, 0)),
        ],
        out_specs=pl.BlockSpec((1, C, HW), lambda n: (n, 0, 0)),
        scratch_shapes=[
            pltpu.VMEM((C, bufw), jnp.float32),              # zero-halo staging
            pltpu.VMEM((9 * _TAP_STRIDE, HW), jnp.float32),  # stacked-tap RHS
        ],
        compiler_params=pltpu.CompilerParams(
            # Parallel batch axis: shards the 2 images across v7x's 2 TCs;
            # on 1-TC parts (v5e/v6e) it is just a 2-step serial loop.
            dimension_semantics=("parallel",)),
    )(x, w1, w2, b1, b2)

    return out.reshape(N, C, H, W).astype(x_nchw.dtype)


def _reference_forward(x, params, eps=1e-5):
    """Pure-JAX reference (NCHW, mirrors the PyTorch module in eval mode)."""
    def conv(x, w):
        return jax.lax.conv_general_dilated(
            x, w, window_strides=(1, 1), padding=((1, 1), (1, 1)),
            dimension_numbers=("NCHW", "OIHW", "NCHW"))

    def bn(x, g, b, m, v):
        s = (g / jnp.sqrt(v + eps))[None, :, None, None]
        return (x - m[None, :, None, None]) * s + b[None, :, None, None]

    out = conv(x, params["w1"])
    out = jax.nn.relu(bn(out, params["g1"], params["b1"],
                         params["m1"], params["v1"]))
    out = conv(out, params["w2"])
    out = bn(out, params["g2"], params["b2"], params["m2"], params["v2"]) + x
    return jax.nn.relu(out)


if __name__ == "__main__":
    N, C, H, W = 2, 4, 16, 16  # in_channel == out_channel, stride=1

    key = jax.random.PRNGKey(0)
    keys = jax.random.split(key, 11)

    params = {
        "w1": 0.1 * jax.random.normal(keys[0], (C, C, 3, 3), jnp.float32),
        "w2": 0.1 * jax.random.normal(keys[1], (C, C, 3, 3), jnp.float32),
        "g1": 1.0 + 0.1 * jax.random.normal(keys[2], (C,), jnp.float32),
        "b1": 0.1 * jax.random.normal(keys[3], (C,), jnp.float32),
        "m1": 0.1 * jax.random.normal(keys[4], (C,), jnp.float32),
        "v1": 1.0 + 0.1 * jax.random.uniform(keys[5], (C,), jnp.float32),
        "g2": 1.0 + 0.1 * jax.random.normal(keys[6], (C,), jnp.float32),
        "b2": 0.1 * jax.random.normal(keys[7], (C,), jnp.float32),
        "m2": 0.1 * jax.random.normal(keys[8], (C,), jnp.float32),
        "v2": 1.0 + 0.1 * jax.random.uniform(keys[9], (C,), jnp.float32),
    }
    x = jax.random.normal(keys[10], (N, C, H, W), jnp.float32)

    out = basic_block_forward(x, params)
    out = jax.block_until_ready(out)

    ref = _reference_forward(x, params)
    assert out.shape == (N, C, H, W)
    assert jnp.allclose(out, ref, rtol=1e-4, atol=1e-4), (
        f"max abs err = {jnp.max(jnp.abs(out - ref))}")

    print("KERNEL_OK")
</pallas_src>

<mosaic_0001>
module attributes {stable_mosaic.version = 11 : i64} {
  func.func @kernel(%arg0: i32, %arg1: memref<1x4x256xf32, #tpu.memory_space<vmem>>, %arg2: memref<4x72xf32, #tpu.memory_space<vmem>>, %arg3: memref<4x72xf32, #tpu.memory_space<vmem>>, %arg4: memref<4x1xf32, #tpu.memory_space<vmem>>, %arg5: memref<4x1xf32, #tpu.memory_space<vmem>>, %arg6: memref<1x4x256xf32, #tpu.memory_space<vmem>>, %arg7: memref<4x512xf32, #tpu.memory_space<vmem>>, %arg8: memref<72x256xf32, #tpu.memory_space<vmem>>) attributes {dimension_semantics = [#tpu.dimension_semantics<parallel>], iteration_bounds = array<i64: 2>, scalar_prefetch = 0 : i64, scratch_operands = 2 : i64, tpu.core_type = #tpu.core_type<tc>, window_params = [{transform_indices = @transform_0, window_bounds = array<i64: 1, 4, 256>}, {pipeline_mode = #tpu.pipeline_mode<synchronous>, transform_indices = @transform_1, window_bounds = array<i64: 4, 72>}, {pipeline_mode = #tpu.pipeline_mode<synchronous>, transform_indices = @transform_2, window_bounds = array<i64: 4, 72>}, {pipeline_mode = #tpu.pipeline_mode<synchronous>, transform_indices = @transform_3, window_bounds = array<i64: 4, 1>}, {pipeline_mode = #tpu.pipeline_mode<synchronous>, transform_indices = @transform_4, window_bounds = array<i64: 4, 1>}, {transform_indices = @transform_5, window_bounds = array<i64: 1, 4, 256>}]} {
    %cst = arith.constant 0.000000e+00 : f32
    %0 = vector.broadcast %cst : f32 to vector<4x512xf32>
    %c0 = arith.constant 0 : index
    %c0_0 = arith.constant 0 : index
    %1 = vector.load %arg7[%c0, %c0_0] : memref<4x512xf32, #tpu.memory_space<vmem>>, vector<4x512xf32>
    tpu.vector_store %arg7[%c0, %c0_0], %0 {strides = array<i32>} : memref<4x512xf32, #tpu.memory_space<vmem>>, vector<4x512xf32>,
    %cst_1 = arith.constant 0.000000e+00 : f32
    %2 = vector.broadcast %cst_1 : f32 to vector<72x256xf32>
    %c0_2 = arith.constant 0 : index
    %c0_3 = arith.constant 0 : index
    %3 = vector.load %arg8[%c0_2, %c0_3] : memref<72x256xf32, #tpu.memory_space<vmem>>, vector<72x256xf32>
    tpu.vector_store %arg8[%c0_2, %c0_3], %2 {strides = array<i32>} : memref<72x256xf32, #tpu.memory_space<vmem>>, vector<72x256xf32>,
    %c0_4 = arith.constant 0 : index
    %c0_5 = arith.constant 0 : index
    %c0_6 = arith.constant 0 : index
    %4 = vector.load %arg1[%c0_4, %c0_5, %c0_6] : memref<1x4x256xf32, #tpu.memory_space<vmem>>, vector<1x4x256xf32>
    %5 = vector.shape_cast %4 : vector<1x4x256xf32> to vector<4x256xf32>
    %c0_7 = arith.constant 0 : index
    %c128 = arith.constant 128 : index
    %6 = vector.load %arg7[%c0_7, %c128] : memref<4x512xf32, #tpu.memory_space<vmem>>, vector<4x256xf32>
    tpu.vector_store %arg7[%c0_7, %c128], %5 {strides = array<i32>} : memref<4x512xf32, #tpu.memory_space<vmem>>, vector<4x256xf32>,
    %7 = tpu.iota {dimensions = array<i32: 1>} : vector<1x256xi32>
    %c16_i32 = arith.constant 16 : i32
    %c0_i32 = arith.constant 0 : i32
    %8 = arith.cmpi eq, %c16_i32, %c0_i32 : i32
    %c1_i32 = arith.constant 1 : i32
    %9 = arith.select %8, %c1_i32, %c16_i32 : i32
    %10 = vector.broadcast %9 : i32 to vector<1x256xi32>
    %11 = arith.remsi %7, %10 : vector<1x256xi32>
    %c0_i32_8 = arith.constant 0 : i32
    %12 = vector.broadcast %c0_i32_8 : i32 to vector<1x256xi32>
    %13 = arith.cmpi ne, %11, %12 : vector<1x256xi32>
    %c0_i32_9 = arith.constant 0 : i32
    %14 = vector.broadcast %c0_i32_9 : i32 to vector<1x256xi32>
    %15 = arith.cmpi slt, %11, %14 : vector<1x256xi32>
    %c0_i32_10 = arith.constant 0 : i32
    %16 = arith.cmpi slt, %9, %c0_i32_10 : i32
    %17 = vector.broadcast %16 : i1 to vector<1x256xi1>
    %18 = vector.broadcast %17 : vector<1x256xi1> to vector<1x256xi1>
    %19 = arith.xori %15, %18 : vector<1x256xi1>
    %20 = arith.andi %19, %13 : vector<1x256xi1>
    %21 = vector.broadcast %9 : i32 to vector<1x256xi32>
    %22 = arith.addi %11, %21 : vector<1x256xi32>
    %23 = arith.select %20, %22, %11 : vector<1x256xi1>, vector<1x256xi32>
    %c1_i32_11 = arith.constant 1 : i32
    %24 = vector.broadcast %c1_i32_11 : i32 to vector<1x256xi32>
    %25 = arith.cmpi sge, %23, %24 : vector<1x256xi32>
    %c14_i32 = arith.constant 14 : i32
    %26 = vector.broadcast %c14_i32 : i32 to vector<1x256xi32>
    %27 = arith.cmpi sle, %23, %26 : vector<1x256xi32>
    %c0_12 = arith.constant 0 : index
    %c111 = arith.constant 111 : index
    %28 = vector.load %arg7[%c0_12, %c111] : memref<4x512xf32, #tpu.memory_space<vmem>>, vector<4x256xf32>
    %cst_13 = arith.constant 0.000000e+00 : f32
    %29 = vector.shape_cast %25 : vector<1x256xi1> to vector<1x256xi1>
    %30 = vector.broadcast %29 : vector<1x256xi1> to vector<4x256xi1>
    %31 = vector.broadcast %cst_13 : f32 to vector<4x256xf32>
    %32 = arith.select %30, %28, %31 : vector<4x256xi1>, vector<4x256xf32>
    %c0_14 = arith.constant 0 : index
    %c0_15 = arith.constant 0 : index
    %33 = vector.load %arg8[%c0_14, %c0_15] : memref<72x256xf32, #tpu.memory_space<vmem>>, vector<4x256xf32>
    tpu.vector_store %arg8[%c0_14, %c0_15], %32 {strides = array<i32>} : memref<72x256xf32, #tpu.memory_space<vmem>>, vector<4x256xf32>,
    %c0_16 = arith.constant 0 : index
    %c112 = arith.constant 112 : index
    %34 = vector.load %arg7[%c0_16, %c112] : memref<4x512xf32, #tpu.memory_space<vmem>>, vector<4x256xf32>
    %c8 = arith.constant 8 : index
    %c0_17 = arith.constant 0 : index
    %35 = vector.load %arg8[%c8, %c0_17] : memref<72x256xf32, #tpu.memory_space<vmem>>, vector<4x256xf32>
    tpu.vector_store %arg8[%c8, %c0_17], %34 {strides = array<i32>} : memref<72x256xf32, #tpu.memory_space<vmem>>, vector<4x256xf32>,
    %c0_18 = arith.constant 0 : index
    %c113 = arith.constant 113 : index
    %36 = vector.load %arg7[%c0_18, %c113] : memref<4x512xf32, #tpu.memory_space<vmem>>, vector<4x256xf32>
    %cst_19 = arith.constant 0.000000e+00 : f32
    %37 = vector.shape_cast %27 : vector<1x256xi1> to vector<1x256xi1>
    %38 = vector.broadcast %37 : vector<1x256xi1> to vector<4x256xi1>
    %39 = vector.broadcast %cst_19 : f32 to vector<4x256xf32>
    %40 = arith.select %38, %36, %39 : vector<4x256xi1>, vector<4x256xf32>
    %c16 = arith.constant 16 : index
    %c0_20 = arith.constant 0 : index
    %41 = vector.load %arg8[%c16, %c0_20] : memref<72x256xf32, #tpu.memory_space<vmem>>, vector<4x256xf32>
    tpu.vector_store %arg8[%c16, %c0_20], %40 {strides = array<i32>} : memref<72x256xf32, #tpu.memory_space<vmem>>, vector<4x256xf32>,
    %c0_21 = arith.constant 0 : index
    %c127 = arith.constant 127 : index
    %42 = vector.load %arg7[%c0_21, %c127] : memref<4x512xf32, #tpu.memory_space<vmem>>, vector<4x256xf32>
    %cst_22 = arith.constant 0.000000e+00 : f32
    %43 = vector.shape_cast %25 : vector<1x256xi1> to vector<1x256xi1>
    %44 = vector.broadcast %43 : vector<1x256xi1> to vector<4x256xi1>
    %45 = vector.broadcast %cst_22 : f32 to vector<4x256xf32>
    %46 = arith.select %44, %42, %45 : vector<4x256xi1>, vector<4x256xf32>
    %c24 = arith.constant 24 : index
    %c0_23 = arith.constant 0 : index
    %47 = vector.load %arg8[%c24, %c0_23] : memref<72x256xf32, #tpu.memory_space<vmem>>, vector<4x256xf32>
    tpu.vector_store %arg8[%c24, %c0_23], %46 {strides = array<i32>} : memref<72x256xf32, #tpu.memory_space<vmem>>, vector<4x256xf32>,
    %c0_24 = arith.constant 0 : index
    %c128_25 = arith.constant 128 : index
    %48 = vector.load %arg7[%c0_24, %c128_25] : memref<4x512xf32, #tpu.memory_space<vmem>>, vector<4x256xf32>
    %c32 = arith.constant 32 : index
    %c0_26 = arith.constant 0 : index
    %49 = vector.load %arg8[%c32, %c0_26] : memref<72x256xf32, #tpu.memory_space<vmem>>, vector<4x256xf32>
    tpu.vector_store %arg8[%c32, %c0_26], %48 {strides = array<i32>} : memref<72x256xf32, #tpu.memory_space<vmem>>, vector<4x256xf32>,
    %c0_27 = arith.constant 0 : index
    %c129 = arith.constant 129 : index
    %50 = vector.load %arg7[%c0_27, %c129] : memref<4x512xf32, #tpu.memory_space<vmem>>, vector<4x256xf32>
    %cst_28 = arith.constant 0.000000e+00 : f32
    %51 = vector.shape_cast %27 : vector<1x256xi1> to vector<1x256xi1>
    %52 = vector.broadcast %51 : vector<1x256xi1> to vector<4x256xi1>
    %53 = vector.broadcast %cst_28 : f32 to vector<4x256xf32>
    %54 = arith.select %52, %50, %53 : vector<4x256xi1>, vector<4x256xf32>
    %c40 = arith.constant 40 : index
    %c0_29 = arith.constant 0 : index
    %55 = vector.load %arg8[%c40, %c0_29] : memref<72x256xf32, #tpu.memory_space<vmem>>, vector<4x256xf32>
    tpu.vector_store %arg8[%c40, %c0_29], %54 {strides = array<i32>} : memref<72x256xf32, #tpu.memory_space<vmem>>, vector<4x256xf32>,
    %c0_30 = arith.constant 0 : index
    %c143 = arith.constant 143 : index
    %56 = vector.load %arg7[%c0_30, %c143] : memref<4x512xf32, #tpu.memory_space<vmem>>, vector<4x256xf32>
    %cst_31 = arith.constant 0.000000e+00 : f32
    %57 = vector.shape_cast %25 : vector<1x256xi1> to vector<1x256xi1>
    %58 = vector.broadcast %57 : vector<1x256xi1> to vector<4x256xi1>
    %59 = vector.broadcast %cst_31 : f32 to vector<4x256xf32>
    %60 = arith.select %58, %56, %59 : vector<4x256xi1>, vector<4x256xf32>
    %c48 = arith.constant 48 : index
    %c0_32 = arith.constant 0 : index
    %61 = vector.load %arg8[%c48, %c0_32] : memref<72x256xf32, #tpu.memory_space<vmem>>, vector<4x256xf32>
    tpu.vector_store %arg8[%c48, %c0_32], %60 {strides = array<i32>} : memref<72x256xf32, #tpu.memory_space<vmem>>, vector<4x256xf32>,
    %c0_33 = arith.constant 0 : index
    %c144 = arith.constant 144 : index
    %62 = vector.load %arg7[%c0_33, %c144] : memref<4x512xf32, #tpu.memory_space<vmem>>, vector<4x256xf32>
    %c56 = arith.constant 56 : index
    %c0_34 = arith.constant 0 : index
    %63 = vector.load %arg8[%c56, %c0_34] : memref<72x256xf32, #tpu.memory_space<vmem>>, vector<4x256xf32>
    tpu.vector_store %arg8[%c56, %c0_34], %62 {strides = array<i32>} : memref<72x256xf32, #tpu.memory_space<vmem>>, vector<4x256xf32>,
    %c0_35 = arith.constant 0 : index
    %c145 = arith.constant 145 : index
    %64 = vector.load %arg7[%c0_35, %c145] : memref<4x512xf32, #tpu.memory_space<vmem>>, vector<4x256xf32>
    %cst_36 = arith.constant 0.000000e+00 : f32
    %65 = vector.shape_cast %27 : vector<1x256xi1> to vector<1x256xi1>
    %66 = vector.broadcast %65 : vector<1x256xi1> to vector<4x256xi1>
    %67 = vector.broadcast %cst_36 : f32 to vector<4x256xf32>
    %68 = arith.select %66, %64, %67 : vector<4x256xi1>, vector<4x256xf32>
    %c64 = arith.constant 64 : index
    %c0_37 = arith.constant 0 : index
    %69 = vector.load %arg8[%c64, %c0_37] : memref<72x256xf32, #tpu.memory_space<vmem>>, vector<4x256xf32>
    tpu.vector_store %arg8[%c64, %c0_37], %68 {strides = array<i32>} : memref<72x256xf32, #tpu.memory_space<vmem>>, vector<4x256xf32>,
    %c0_38 = arith.constant 0 : index
    %c0_39 = arith.constant 0 : index
    %70 = vector.load %arg2[%c0_38, %c0_39] : memref<4x72xf32, #tpu.memory_space<vmem>>, vector<4x72xf32>
    %c0_40 = arith.constant 0 : index
    %c0_41 = arith.constant 0 : index
    %71 = vector.load %arg8[%c0_40, %c0_41] : memref<72x256xf32, #tpu.memory_space<vmem>>, vector<72x256xf32>
    %cst_42 = arith.constant dense<0.000000e+00> : vector<4x256xf32>
    %72 = tpu.matmul %70, %71, %cst_42 {dimension_numbers = #tpu.dot_dimension_numbers<[1], [0], [0], [1], [0, 0, 1, 1], [], []>} : vector<4x72xf32>, vector<72x256xf32>, vector<4x256xf32> -> vector<4x256xf32>
    %c0_43 = arith.constant 0 : index
    %c0_44 = arith.constant 0 : index
    %73 = vector.load %arg4[%c0_43, %c0_44] : memref<4x1xf32, #tpu.memory_space<vmem>>, vector<4x1xf32>
    %74 = vector.broadcast %73 : vector<4x1xf32> to vector<4x256xf32>
    %75 = arith.addf %72, %74 : vector<4x256xf32>
    %cst_45 = arith.constant 0.000000e+00 : f32
    %76 = vector.broadcast %cst_45 : f32 to vector<4x256xf32>
    %77 = arith.maximumf %75, %76 : vector<4x256xf32>
    %c0_46 = arith.constant 0 : index
    %c128_47 = arith.constant 128 : index
    %78 = vector.load %arg7[%c0_46, %c128_47] : memref<4x512xf32, #tpu.memory_space<vmem>>, vector<4x256xf32>
    tpu.vector_store %arg7[%c0_46, %c128_47], %77 {strides = array<i32>} : memref<4x512xf32, #tpu.memory_space<vmem>>, vector<4x256xf32>,
    %c0_48 = arith.constant 0 : index
    %c111_49 = arith.constant 111 : index
    %79 = vector.load %arg7[%c0_48, %c111_49] : memref<4x512xf32, #tpu.memory_space<vmem>>, vector<4x256xf32>
    %cst_50 = arith.constant 0.000000e+00 : f32
    %80 = vector.shape_cast %25 : vector<1x256xi1> to vector<1x256xi1>
    %81 = vector.broadcast %80 : vector<1x256xi1> to vector<4x256xi1>
    %82 = vector.broadcast %cst_50 : f32 to vector<4x256xf32>
    %83 = arith.select %81, %79, %82 : vector<4x256xi1>, vector<4x256xf32>
    %c0_51 = arith.constant 0 : index
    %c0_52 = arith.constant 0 : index
    %84 = vector.load %arg8[%c0_51, %c0_52] : memref<72x256xf32, #tpu.memory_space<vmem>>, vector<4x256xf32>
    tpu.vector_store %arg8[%c0_51, %c0_52], %83 {strides = array<i32>} : memref<72x256xf32, #tpu.memory_space<vmem>>, vector<4x256xf32>,
    %c0_53 = arith.constant 0 : index
    %c112_54 = arith.constant 112 : index
    %85 = vector.load %arg7[%c0_53, %c112_54] : memref<4x512xf32, #tpu.memory_space<vmem>>, vector<4x256xf32>
    %c8_55 = arith.constant 8 : index
    %c0_56 = arith.constant 0 : index
    %86 = vector.load %arg8[%c8_55, %c0_56] : memref<72x256xf32, #tpu.memory_space<vmem>>, vector<4x256xf32>
    tpu.vector_store %arg8[%c8_55, %c0_56], %85 {strides = array<i32>} : memref<72x256xf32, #tpu.memory_space<vmem>>, vector<4x256xf32>,
    %c0_57 = arith.constant 0 : index
    %c113_58 = arith.constant 113 : index
    %87 = vector.load %arg7[%c0_57, %c113_58] : memref<4x512xf32, #tpu.memory_space<vmem>>, vector<4x256xf32>
    %cst_59 = arith.constant 0.000000e+00 : f32
    %88 = vector.shape_cast %27 : vector<1x256xi1> to vector<1x256xi1>
    %89 = vector.broadcast %88 : vector<1x256xi1> to vector<4x256xi1>
    %90 = vector.broadcast %cst_59 : f32 to vector<4x256xf32>
    %91 = arith.select %89, %87, %90 : vector<4x256xi1>, vector<4x256xf32>
    %c16_60 = arith.constant 16 : index
    %c0_61 = arith.constant 0 : index
    %92 = vector.load %arg8[%c16_60, %c0_61] : memref<72x256xf32, #tpu.memory_space<vmem>>, vector<4x256xf32>
    tpu.vector_store %arg8[%c16_60, %c0_61], %91 {strides = array<i32>} : memref<72x256xf32, #tpu.memory_space<vmem>>, vector<4x256xf32>,
    %c0_62 = arith.constant 0 : index
    %c127_63 = arith.constant 127 : index
    %93 = vector.load %arg7[%c0_62, %c127_63] : memref<4x512xf32, #tpu.memory_space<vmem>>, vector<4x256xf32>
    %cst_64 = arith.constant 0.000000e+00 : f32
    %94 = vector.shape_cast %25 : vector<1x256xi1> to vector<1x256xi1>
    %95 = vector.broadcast %94 : vector<1x256xi1> to vector<4x256xi1>
    %96 = vector.broadcast %cst_64 : f32 to vector<4x256xf32>
    %97 = arith.select %95, %93, %96 : vector<4x256xi1>, vector<4x256xf32>
    %c24_65 = arith.constant 24 : index
    %c0_66 = arith.constant 0 : index
    %98 = vector.load %arg8[%c24_65, %c0_66] : memref<72x256xf32, #tpu.memory_space<vmem>>, vector<4x256xf32>
    tpu.vector_store %arg8[%c24_65, %c0_66], %97 {strides = array<i32>} : memref<72x256xf32, #tpu.memory_space<vmem>>, vector<4x256xf32>,
    %c0_67 = arith.constant 0 : index
    %c128_68 = arith.constant 128 : index
    %99 = vector.load %arg7[%c0_67, %c128_68] : memref<4x512xf32, #tpu.memory_space<vmem>>, vector<4x256xf32>
    %c32_69 = arith.constant 32 : index
    %c0_70 = arith.constant 0 : index
    %100 = vector.load %arg8[%c32_69, %c0_70] : memref<72x256xf32, #tpu.memory_space<vmem>>, vector<4x256xf32>
    tpu.vector_store %arg8[%c32_69, %c0_70], %99 {strides = array<i32>} : memref<72x256xf32, #tpu.memory_space<vmem>>, vector<4x256xf32>,
    %c0_71 = arith.constant 0 : index
    %c129_72 = arith.constant 129 : index
    %101 = vector.load %arg7[%c0_71, %c129_72] : memref<4x512xf32, #tpu.memory_space<vmem>>, vector<4x256xf32>
    %cst_73 = arith.constant 0.000000e+00 : f32
    %102 = vector.shape_cast %27 : vector<1x256xi1> to vector<1x256xi1>
    %103 = vector.broadcast %102 : vector<1x256xi1> to vector<4x256xi1>
    %104 = vector.broadcast %cst_73 : f32 to vector<4x256xf32>
    %105 = arith.select %103, %101, %104 : vector<4x256xi1>, vector<4x256xf32>
    %c40_74 = arith.constant 40 : index
    %c0_75 = arith.constant 0 : index
    %106 = vector.load %arg8[%c40_74, %c0_75] : memref<72x256xf32, #tpu.memory_space<vmem>>, vector<4x256xf32>
    tpu.vector_store %arg8[%c40_74, %c0_75], %105 {strides = array<i32>} : memref<72x256xf32, #tpu.memory_space<vmem>>, vector<4x256xf32>,
    %c0_76 = arith.constant 0 : index
    %c143_77 = arith.constant 143 : index
    %107 = vector.load %arg7[%c0_76, %c143_77] : memref<4x512xf32, #tpu.memory_space<vmem>>, vector<4x256xf32>
    %cst_78 = arith.constant 0.000000e+00 : f32
    %108 = vector.shape_cast %25 : vector<1x256xi1> to vector<1x256xi1>
    %109 = vector.broadcast %108 : vector<1x256xi1> to vector<4x256xi1>
    %110 = vector.broadcast %cst_78 : f32 to vector<4x256xf32>
    %111 = arith.select %109, %107, %110 : vector<4x256xi1>, vector<4x256xf32>
    %c48_79 = arith.constant 48 : index
    %c0_80 = arith.constant 0 : index
    %112 = vector.load %arg8[%c48_79, %c0_80] : memref<72x256xf32, #tpu.memory_space<vmem>>, vector<4x256xf32>
    tpu.vector_store %arg8[%c48_79, %c0_80], %111 {strides = array<i32>} : memref<72x256xf32, #tpu.memory_space<vmem>>, vector<4x256xf32>,
    %c0_81 = arith.constant 0 : index
    %c144_82 = arith.constant 144 : index
    %113 = vector.load %arg7[%c0_81, %c144_82] : memref<4x512xf32, #tpu.memory_space<vmem>>, vector<4x256xf32>
    %c56_83 = arith.constant 56 : index
    %c0_84 = arith.constant 0 : index
    %114 = vector.load %arg8[%c56_83, %c0_84] : memref<72x256xf32, #tpu.memory_space<vmem>>, vector<4x256xf32>
    tpu.vector_store %arg8[%c56_83, %c0_84], %113 {strides = array<i32>} : memref<72x256xf32, #tpu.memory_space<vmem>>, vector<4x256xf32>,
    %c0_85 = arith.constant 0 : index
    %c145_86 = arith.constant 145 : index
    %115 = vector.load %arg7[%c0_85, %c145_86] : memref<4x512xf32, #tpu.memory_space<vmem>>, vector<4x256xf32>
    %cst_87 = arith.constant 0.000000e+00 : f32
    %116 = vector.shape_cast %27 : vector<1x256xi1> to vector<1x256xi1>
    %117 = vector.broadcast %116 : vector<1x256xi1> to vector<4x256xi1>
    %118 = vector.broadcast %cst_87 : f32 to vector<4x256xf32>
    %119 = arith.select %117, %115, %118 : vector<4x256xi1>, vector<4x256xf32>
    %c64_88 = arith.constant 64 : index
    %c0_89 = arith.constant 0 : index
    %120 = vector.load %arg8[%c64_88, %c0_89] : memref<72x256xf32, #tpu.memory_space<vmem>>, vector<4x256xf32>
    tpu.vector_store %arg8[%c64_88, %c0_89], %119 {strides = array<i32>} : memref<72x256xf32, #tpu.memory_space<vmem>>, vector<4x256xf32>,
    %c0_90 = arith.constant 0 : index
    %c0_91 = arith.constant 0 : index
    %121 = vector.load %arg3[%c0_90, %c0_91] : memref<4x72xf32, #tpu.memory_space<vmem>>, vector<4x72xf32>
    %c0_92 = arith.constant 0 : index
    %c0_93 = arith.constant 0 : index
    %122 = vector.load %arg8[%c0_92, %c0_93] : memref<72x256xf32, #tpu.memory_space<vmem>>, vector<72x256xf32>
    %cst_94 = arith.constant dense<0.000000e+00> : vector<4x256xf32>
    %123 = tpu.matmul %121, %122, %cst_94 {dimension_numbers = #tpu.dot_dimension_numbers<[1], [0], [0], [1], [0, 0, 1, 1], [], []>} : vector<4x72xf32>, vector<72x256xf32>, vector<4x256xf32> -> vector<4x256xf32>
    %c0_95 = arith.constant 0 : index
    %c0_96 = arith.constant 0 : index
    %124 = vector.load %arg5[%c0_95, %c0_96] : memref<4x1xf32, #tpu.memory_space<vmem>>, vector<4x1xf32>
    %125 = vector.broadcast %124 : vector<4x1xf32> to vector<4x256xf32>
    %126 = arith.addf %123, %125 : vector<4x256xf32>
    %127 = arith.addf %126, %5 : vector<4x256xf32>
    %cst_97 = arith.constant 0.000000e+00 : f32
    %128 = vector.broadcast %cst_97 : f32 to vector<4x256xf32>
    %129 = arith.maximumf %127, %128 : vector<4x256xf32>
    %c0_98 = arith.constant 0 : index
    %c0_99 = arith.constant 0 : index
    %c0_100 = arith.constant 0 : index
    %130 = vector.load %arg6[%c0_98, %c0_99, %c0_100] : memref<1x4x256xf32, #tpu.memory_space<vmem>>, vector<1x4x256xf32>
    %131 = vector.shape_cast %130 : vector<1x4x256xf32> to vector<4x256xf32>
    %132 = vector.shape_cast %129 : vector<4x256xf32> to vector<1x4x256xf32>
    tpu.vector_store %arg6[%c0_98, %c0_99, %c0_100], %132 {strides = array<i32>} : memref<1x4x256xf32, #tpu.memory_space<vmem>>, vector<1x4x256xf32>,
    return
  }
  func.func @transform_0(%arg0: i32) -> (i32, i32, i32) {
    %c0_i32 = arith.constant 0 : i32
    %c0_i32_0 = arith.constant 0 : i32
    %c0_i32_1 = arith.constant 0 : i32
    return %arg0, %c0_i32, %c0_i32_0 : i32, i32, i32
  }
  func.func @transform_1(%arg0: i32) -> (i32, i32) {
    %c0_i32 = arith.constant 0 : i32
    %c0_i32_0 = arith.constant 0 : i32
    %c0_i32_1 = arith.constant 0 : i32
    return %c0_i32, %c0_i32_0 : i32, i32
  }
  func.func @transform_2(%arg0: i32) -> (i32, i32) {
    %c0_i32 = arith.constant 0 : i32
    %c0_i32_0 = arith.constant 0 : i32
    %c0_i32_1 = arith.constant 0 : i32
    return %c0_i32, %c0_i32_0 : i32, i32
  }
  func.func @transform_3(%arg0: i32) -> (i32, i32) {
    %c0_i32 = arith.constant 0 : i32
    %c0_i32_0 = arith.constant 0 : i32
    %c0_i32_1 = arith.constant 0 : i32
    return %c0_i32, %c0_i32_0 : i32, i32
  }
  func.func @transform_4(%arg0: i32) -> (i32, i32) {
    %c0_i32 = arith.constant 0 : i32
    %c0_i32_0 = arith.constant 0 : i32
    %c0_i32_1 = arith.constant 0 : i32
    return %c0_i32, %c0_i32_0 : i32, i32
  }
  func.func @transform_5(%arg0: i32) -> (i32, i32, i32) {
    %c0_i32 = arith.constant 0 : i32
    %c0_i32_0 = arith.constant 0 : i32
    %c0_i32_1 = arith.constant 0 : i32
    return %arg0, %c0_i32, %c0_i32_0 : i32, i32, i32
  }
}

</mosaic_0001>

<bundles_post_ra>
// kernel: basic_block_forward.1
= control target key start
LH: loop header
LB: loop body
LE: loop exit
PB: predicated region body
PF: predicated region fallthrough
CT: control target
= control target key end

     0   :  { %s961_s18 = smov 0   ;;  %s1162_s0 = inlined_call_operand.vmem [shape: f32[2,4,256], index: 0, kind: input, shape index: {}]   ;;  %s1163_s1 = inlined_call_operand.vmem [shape: f32[4,72], index: 1, kind: input, shape index: {}]   ;;  %s1164_s2 = inlined_call_operand.vmem [shape: f32[4,72], index: 2, kind: input, shape index: {}]   ;;  %s1165_s3 = inlined_call_operand.vmem [shape: f32[4,1], index: 3, kind: input, shape index: {}]   ;;  %s1166_s4 = inlined_call_operand.vmem [shape: f32[4,1], index: 4, kind: input, shape index: {}]   ;;  %s1167_s5 = inlined_call_operand.vmem [shape: f32[2,4,256], index: 5, kind: output, shape index: {}]  }
   0x1 LB: > { %s875_s19 = sadd.s32 4294967295, %s919_s18   ;;  %p879_p0 = scmp.ge.s32.totalorder %s919_s18, 1  ;;  %s919_s18 = sphi %s961_s18, %s15_s18  }
   0x2   : > { %p187_p1 = scmp.lt.s32.totalorder %s919_s18, 3 }
   0x4   : > { %p188_p2 = pnand %p879_p0, %p187_p1 }
   0x5   : > { %p215_p3 = scmp.lt.s32.totalorder (!%p188_p2), %s875_s19, 1  ;;  %s922_s24 = smov (!%p188_p2), 111  }
   0x6   : > { %191 = sbr.rel (%p188_p2) target bundleno = 766 (0x2fe), region = 40  ;;  %s923_s25 = smov (!%p188_p2), 112  }
   0x7   : > { %s924_s26 = smov (!%p188_p2), 113   ;;  %s925_s27 = smov (!%p188_p2), 127  }
   0x8   : > { %s926_s28 = smov (!%p188_p2), 1   ;;  %s927_s29 = smov (!%p188_p2), 15  }
   0x9   : > { %s928_s30 = smov (!%p188_p2), 16   ;;  %s929_s6 = smov (!%p188_p2), 17  }
   0xb   : > { %v921_v0 = vmov 0.0   ;;  %s1177_s19 = smov (!%p215_p3, %s875_s19), 1  ;;  %v930_v13 = vmov 0   ;;  %v467_v14 = vld [vmem:[%s1165_s3] sm:$0xf]  ;;  %v247_v15 = vlaneseq  ;;  %vm421_vm0 = vcmask 916480  }
   0xc   : > { %226 = vst [vmem:[#allocation2 + $0x8] sm:$0xff] %v921_v0  ;;  %225 = vst [vmem:[#allocation2] sm:$0xff] %v921_v0  ;;  %541 = vmatprep.mubr.f32.mxu0 %v921_v0  ;;  %801 = vmatprep.mubr.f32.mxu1 %v921_v0  ;;  %s888_s20 = sshll.u32 %s1177_s19, 3  ;;  %vm401_vm1 = vcmask 924672   ;;  %vm439_vm4 = vcmask 908288   ;;  %vm381_vm7 = vcmask 1039360  }
   0xd   : > { %227 = vst [vmem:[#allocation3] sm:$0xff] %v921_v0  ;;  %228 = vst [vmem:[#allocation3 + $0x38] sm:$0xff] %v921_v0  ;;  %s219_s23 = scalar_lea.vmem %s1162_s0, %s888_s20  ;;  %908 = vset.pattern.permute.xlu0 %v930_v13  ;;  %v248_v16 = vand.u32 127, %v247_v15  ;;  %vm355_vm8 = vcmask 7168   ;;  %vm335_vm9 = vcmask 121856   ;;  %vm313_vm10 = vcmask 130048   ;;  %s224_s17 = scalar_lea.vmem %s1167_s5, %s888_s20 }
   0xe   : > { %229 = vst [vmem:[#allocation3 + $0x78] sm:$0xff] %v921_v0  ;;  %230 = vst [vmem:[#allocation3 + $0x58] sm:$0xff] %v921_v0  ;;  %v977_v1 = vld [vmem:[%s219_s23] sm:$0xff]  ;;  %vm293_vm11 = vcmask 138240   ;;  %vm473_vm12 = vcmask 588800  }
   0xf   : > { %231 = vst [vmem:[#allocation3 + $0x20] sm:$0xff] %v921_v0  ;;  %232 = vst [vmem:[#allocation3 + $0x8] sm:$0xff] %v921_v0  ;;  %433 = vrot.lane.b32.xlu1 %v977_v1, %s922_s24  ;;  %v984_v3 = vcombine.high %v977_v1, %v977_v1  ;;  %v249_v19 = vadd.s32 128, %v248_v16  ;;  %v254_v24 = vand.u32 15, %v248_v16  ;;  %v709_v29 = vld [vmem:[%s1164_s2] sm:$0xf] }
  0x10   : > { %233 = vst [vmem:[#allocation3 + $0x70] sm:$0xff] %v921_v0  ;;  %234 = vst [vmem:[#allocation3 + $0x80] sm:$0xff] %v921_v0 }
  0x11   : > { %235 = vst [vmem:[#allocation3 + $0x88] sm:$0xff] %v921_v0  ;;  %236 = vst [vmem:[#allocation3 + $0x40] sm:$0xff] %v921_v0  ;;  %v261_v22 = vand.u32 15, %v249_v19  ;;  %vm1027_vm3 = vcmp.ge.s32.totalorder %v254_v24, 1  ;;  %vm1037_vm5 = vcmp.le.s32.totalorder %v254_v24, 14 }
  0x12   : > { %237 = vst [vmem:[#allocation3 + $0x50] sm:$0xff] %v921_v0  ;;  %238 = vst [vmem:[#allocation3 + $0x28] sm:$0xff] %v921_v0 }
  0x13   : > { %239 = vst [vmem:[#allocation3 + $0x10] sm:$0xff] %v921_v0  ;;  %240 = vst [vmem:[#allocation3 + $0x48] sm:$0xff] %v921_v0  ;;  %v429_v2 = vld [vmem:[#allocation2 + $0xc] sm:$0xf]  ;;  %415 = vrot.lane.b32.xlu1 %v977_v1, %s923_s25  ;;  %vm1023_vm2 = vcmp.ge.s32.totalorder %v261_v22, 1  ;;  %vm1041_vm6 = vcmp.le.s32.totalorder %v261_v22, 14 }
  0x14   : > { %241 = vst [vmem:[#allocation3 + $0x30] sm:$0xff] %v921_v0  ;;  %242 = vst [vmem:[#allocation3 + $0x18] sm:$0xff] %v921_v0  ;;  %437 = vrot.lane.b32.xlu0 %v429_v2, %s922_s24  ;;  %v411_v4 = vld [vmem:[#allocation2 + $0xc] sm:$0xf] }
  0x15   : > { %243 = vst [vmem:[#allocation3 + $0x68] sm:$0xff] %v921_v0  ;;  %244 = vst [vmem:[#allocation3 + $0x60] sm:$0xff] %v921_v0  ;;  %v391_v5 = vld [vmem:[#allocation2 + $0xc] sm:$0xf] }
  0x16   : > { %246 = vst [vmem:[#allocation2 + $0x4] sm:$0xff] %v977_v1  ;;  %368 = vst [vmem:[#allocation3 + $0x88] sm:$0xf] %v977_v1  ;;  %v371_v6 = vld [vmem:[#allocation2 + $0xc] sm:$0xf] }
  0x17   : > { %369 = vst [vmem:[#allocation3 + $0x40] sm:$0xf] %v984_v3  ;;  %417 = vrot.lane.b32.xlu1 %v984_v3, %s923_s25 }
  0x18   : > { %419 = vrot.lane.b32.xlu0 %v411_v4, %s923_s25 }
  0x1b   : > { %397 = vrot.lane.b32.xlu1 %v984_v3, %s924_s26 }
  0x1c   : > { %399 = vrot.lane.b32.xlu0 %v391_v5, %s924_s26 }
  0x1d   : > { %v344_v7 = vld [vmem:[#allocation2] sm:$0xff]  ;;  %v345_v9 = vld [vmem:[#allocation2 + $0x8] sm:$0xf] }
  0x1e   : > { %v348_v8 = vcombine.high %v344_v7, %v344_v7  ;;  %v321_v10 = vld [vmem:[#allocation2 + $0x8] sm:$0xf] }
  0x1f   : > { %377 = vrot.lane.b32.xlu1 %v984_v3, %s925_s27  ;;  %v303_v11 = vld [vmem:[#allocation2 + $0x8] sm:$0xf] }
  0x20   : > { %395 = vrot.lane.b32.xlu0 %v977_v1, %s924_s26  ;;  %v279_v12 = vld [vmem:[#allocation2 + $0x8] sm:$0xf] }
  0x23   : > { %375 = vrot.lane.b32.xlu1 %v977_v1, %s925_s27 }
  0x24   : > { %435 = vrot.lane.b32.xlu0 %v984_v3, %s922_s24 }
  0x27   : > { %353 = vrot.lane.b32.xlu1 %v345_v9, %s926_s28 }
  0x28   : > { %379 = vrot.lane.b32.xlu0 %v371_v6, %s925_s27  ;;  %v458_v6 = vld [vmem:[#allocation3 + $0x40] sm:$0xff] }
  0x2b   : > { %331 = vrot.lane.b32.xlu1 %v348_v8, %s927_s29 }
  0x2c   : > { %351 = vrot.lane.b32.xlu0 %v348_v8, %s926_s28 }
  0x2f   : > { %329 = vrot.lane.b32.xlu1 %v344_v7, %s927_s29 }
  0x30   : > { %349 = vrot.lane.b32.xlu0 %v344_v7, %s926_s28 }
  0x33   : > { %311 = vrot.lane.b32.xlu1 %v303_v11, %s928_s30 }
  0x34   : > { %333 = vrot.lane.b32.xlu0 %v321_v10, %s927_s29  ;;  %v457_v10 = vld [vmem:[#allocation3 + $0x88] sm:$0xff] }
  0x37   : > { %291 = vrot.lane.b32.xlu1 %v279_v12, %s929_s6 }
  0x38   : > { %309 = vrot.lane.b32.xlu0 %v348_v8, %s928_s30 }
  0x3b   : > { %287 = vrot.lane.b32.xlu1 %v344_v7, %s929_s6 }
  0x3c   : > { %289 = vrot.lane.b32.xlu0 %v348_v8, %s929_s6 }
  0x40   : > { %307 = vrot.lane.b32.xlu0 %v344_v7, %s928_s30 }
  0x44   : > { %470 = vperm.xlu0 %908, %v467_v14  }
  0x81   : > { %v434_v17 = vpop.permute.xlu1 %433 }
  0x85   : > { %v416_v20 = vpop.permute.xlu1 %415 }
  0x86   : > { %v438_v18 = vpop.permute.xlu0 %437 }
  0x89   : > { %v418_v23 = vpop.permute.xlu1 %417 }
  0x8a   : > { %v420_v21 = vpop.permute.xlu0 %419  ;;  %v422_v26 = vsel %vm421_vm0, %v416_v20, %v418_v23 }
  0x8b   : > { %v423_v27 = vsel %vm421_vm0, %v418_v23, %v420_v21  ;;  %426 = vst [vmem:[#allocation3 + $0x30] sm:$0xf] %v422_v26 }
  0x8c   : > { %427 = vst [vmem:[#allocation3 + $0x18] sm:$0xf] %v423_v27 }
  0x8d   : > { %v398_v30 = vpop.permute.xlu1 %397 }
  0x8e   : > { %v400_v25 = vpop.permute.xlu0 %399 }
  0x8f   : > { %v403_v32 = vsel %vm401_vm1, %v398_v30, %v400_v25 }
  0x90   : > { %v407_v34 = vsel %vm1023_vm2, %v403_v32, 0.0 }
  0x91   : > { %409 = vst [vmem:[#allocation3 + $0x48] sm:$0xf] %v407_v34  ;;  %v378_v38 = vpop.permute.xlu1 %377 }
  0x92   : > { %v396_v31 = vpop.permute.xlu0 %395  ;;  %v463_v60 = vld [vmem:[#allocation3 + $0x30] sm:$0xff] }
  0x93   : > { %v402_v33 = vsel %vm401_vm1, %v396_v31, %v398_v30  ;;  %v464_v58 = vld [vmem:[#allocation3 + $0x18] sm:$0xff] }
  0x94   : > { %v406_v35 = vsel %vm1027_vm3, %v402_v33, 0.0  ;;  %v448_v33 = vld [vmem:[%s1163_s1] sm:$0xf] }
  0x95   : > { %408 = vst [vmem:[#allocation3 + $0x10] sm:$0xf] %v406_v35  ;;  %v376_v44 = vpop.permute.xlu1 %375  ;;  %v674_v35 = vld [vmem:[#allocation2 + $0xc] sm:$0xf] }
  0x96   : > { %v436_v39 = vpop.permute.xlu0 %435  ;;  %v382_v46 = vsel %vm381_vm7, %v376_v44, %v378_v38  ;;  %682 = vrot.lane.b32.xlu0 %v674_v35, %s923_s25 }
  0x97   : > { %v440_v40 = vsel %vm439_vm4, %v434_v17, %v436_v39  ;;  %v441_v41 = vsel %vm439_vm4, %v436_v39, %v438_v18  ;;  %v386_v48 = vsel %vm1037_vm5, %v382_v46, 0.0  ;;  %v691_v39 = vld [vmem:[#allocation2 + $0xc] sm:$0xf] }
  0x98   : > { %v444_v42 = vsel %vm1037_vm5, %v440_v40, 0.0  ;;  %v445_v43 = vsel %vm1041_vm6, %v441_v41, 0.0  ;;  %388 = vst [vmem:[#allocation3 + $0x50] sm:$0xf] %v386_v48  ;;  %v462_v62 = vld [vmem:[#allocation3 + $0x48] sm:$0xff]  ;;  %699 = vrot.lane.b32.xlu1 %v691_v39, %s922_s24 }
  0x99   : > { %446 = vst [vmem:[#allocation3 + $0x68] sm:$0xf] %v444_v42  ;;  %447 = vst [vmem:[#allocation3 + $0x60] sm:$0xf] %v445_v43  ;;  %v354_v50 = vpop.permute.xlu1 %353  ;;  %v636_v40 = vld [vmem:[#allocation2 + $0xc] sm:$0xf] }
  0x9a   : > { %v380_v45 = vpop.permute.xlu0 %379 }
  0x9b   : > { %v383_v47 = vsel %vm381_vm7, %v378_v38, %v380_v45  ;;  %v655_v38 = vld [vmem:[#allocation2 + $0xc] sm:$0xf] }
  0x9c   : > { %v387_v49 = vsel %vm1041_vm6, %v383_v47, 0.0  ;;  %v461_v63 = vld [vmem:[#allocation3 + $0x10] sm:$0xff]  ;;  %663 = vrot.lane.b32.xlu0 %v655_v38, %s924_s26 }
  0x9d   : > { %389 = vst [vmem:[#allocation3 + $0x28] sm:$0xf] %v387_v49  ;;  %v332_v56 = vpop.permute.xlu1 %331 }
  0x9e   : > { %v352_v51 = vpop.permute.xlu0 %351 }
  0x9f   : > { %v357_v52 = vsel %vm355_vm8, %v352_v51, %v354_v50  ;;  %v459_v8 = vld [vmem:[#allocation3 + $0x50] sm:$0xff] }
  0xa0   : > { %v466_v53 = vld [vmem:[#allocation3 + $0x60] sm:$0xff]  ;;  %v465_v54 = vld [vmem:[#allocation3 + $0x68] sm:$0xff]  ;;  %v361_v55 = vsel %vm1023_vm2, %v357_v52, 0.0  ;;  %644 = vrot.lane.b32.xlu0 %v636_v40, %s925_s27 }
  0xa1   : > { %491 = vmatprep.subr.mxu0 %v466_v53  ;;  %363 = vst [vmem:[#allocation3 + $0x80] sm:$0xf] %v361_v55  ;;  %v330_v0 = vpop.permute.xlu1 %329  ;;  %v728_v55 = vld [vmem:[%s1166_s4] sm:$0xf] }
  0xa2   : > { %492 = vmatpush1.msra.mxu0 %v465_v54  ;;  %v350_v57 = vpop.permute.xlu0 %349  ;;  %v336_v5 = vsel %vm335_vm9, %v330_v0, %v332_v56 }
  0xa3   : > { %v356_v59 = vsel %vm355_vm8, %v350_v57, %v352_v51  ;;  %493 = vmatprep.subr.mxu0 %v464_v58  ;;  %v340_v9 = vsel %vm1037_vm5, %v336_v5, 0.0 }
  0xa4   : > { %v360_v61 = vsel %vm1027_vm3, %v356_v59, 0.0  ;;  %494 = vmatpush1.msra.mxu0 %v463_v60  ;;  %v460_v4 = vld [vmem:[#allocation3 + $0x28] sm:$0xff]  ;;  %342 = vst [vmem:[#allocation3 + $0x20] sm:$0xf] %v340_v9 }
  0xa5   : > { %362 = vst [vmem:[#allocation3 + $0x70] sm:$0xf] %v360_v61  ;;  %495 = vmatprep.subr.mxu0 %v462_v62  ;;  %v312_v12 = vpop.permute.xlu1 %311 }
  0xa6   : > { %496 = vmatpush1.msra.mxu0 %v461_v63  ;;  %v334_v2 = vpop.permute.xlu0 %333 }
  0xa7   : > { %497 = vmatprep.subr.mxu0 %v460_v4  ;;  %v337_v7 = vsel %vm335_vm9, %v332_v56, %v334_v2 }
  0xa8   : > { %v341_v11 = vsel %vm1041_vm6, %v337_v7, 0.0  ;;  %498 = vmatpush1.msra.mxu0 %v459_v8  ;;  %v456_v14 = vld [vmem:[#allocation3 + $0x80] sm:$0xff] }
  0xa9   : > { %343 = vst [vmem:[#allocation3 + $0x8] sm:$0xf] %v341_v11  ;;  %499 = vmatprep.subr.mxu0 %v458_v6  ;;  %v292_v17 = vpop.permute.xlu1 %291 }
  0xaa   : > { %v310_v13 = vpop.permute.xlu0 %309  ;;  %500 = vmatpush1.msra.mxu0 %v457_v10 }
  0xab   : > { %501 = vmatprep.subr.mxu0 %v456_v14  ;;  %v315_v15 = vsel %vm313_vm10, %v310_v13, %v312_v12  ;;  %v453_v22 = vld [vmem:[#allocation3 + $0x20] sm:$0xff] }
  0xac   : > { %v455_v16 = vld [vmem:[#allocation3 + $0x70] sm:$0xff]  ;;  %319 = vst [vmem:[#allocation3 + $0x58] sm:$0xf] %v315_v15 }
  0xad   : > { %502 = vmatpush1.msra.mxu0 %v455_v16  ;;  %v288_v23 = vpop.permute.xlu1 %287 }
  0xae   : > { %v290_v18 = vpop.permute.xlu0 %289 }
  0xaf   : > { %v295_v19 = vsel %vm293_vm11, %v290_v18, %v292_v17  ;;  %v294_v25 = vsel %vm293_vm11, %v288_v23, %v290_v18 }
  0xb0   : > { %v454_v20 = vld [vmem:[#allocation3 + $0x8] sm:$0xff]  ;;  %v299_v21 = vsel %vm1023_vm2, %v295_v19, 0.0  ;;  %v298_v27 = vsel %vm1027_vm3, %v294_v25, 0.0 }
  0xb1   : > { %503 = vmatprep.subr.mxu0 %v454_v20  ;;  %301 = vst [vmem:[#allocation3 + $0x38] sm:$0xf] %v299_v21  ;;  %300 = vst [vmem:[#allocation3] sm:$0xf] %v298_v27 }
  0xb2   : > { %v308_v24 = vpop.permute.xlu0 %307  ;;  %504 = vmatpush1.msra.mxu0 %v453_v22 }
  0xb3   : > { %v314_v26 = vsel %vm313_vm10, %v308_v24, %v310_v13  ;;  %v452_v30 = vld [vmem:[#allocation3 + $0x58] sm:$0xff] }
  0xb4   : > { %318 = vst [vmem:[#allocation3 + $0x78] sm:$0xf] %v314_v26  ;;  %505 = vmatprep.subr.mxu0 %v452_v30 }
  0xb8   : > { %v450_v32 = vld [vmem:[#allocation3 + $0x38] sm:$0xff]  ;;  %v449_v34 = vld [vmem:[#allocation3] sm:$0xff] }
  0xbb   : > { %v451_v31 = vld [vmem:[#allocation3 + $0x78] sm:$0xff] }
  0xbc   : > { %506 = vmatpush1.msra.mxu0 %v451_v31 }
  0xbd   : > { %507 = vmatprep.subr.mxu0 %v450_v32 }
  0xbe   : > { %508 = vmatpush1.msra.mxu0 %v449_v34 }
  0xbf   : > { %884 = vmatmul.mubr.msk.f32.vlgmr.msra.gmra.mxu0 %vm473_vm12, %v448_v33  ;;  %v471_v41 = vpop.permute.xlu0 %470 }
 0x108   : > { %v683_v57 = vpop.permute.xlu0 %682 }
 0x10a   : > { %v700_v59 = vpop.permute.xlu1 %699 }
 0x10e   : > { %v664_v58 = vpop.permute.xlu0 %663 }
 0x112   : > { %v645_v60 = vpop.permute.xlu0 %644 }
 0x17f   : > { %v543_v42 = vpop.f32.mrf.mxu0 }
 0x180   : > { %v544_v43 = vadd.f32 %v543_v42, %v471_v41 }
 0x181   : > { %v545_v44 = vpop.f32.mrf.mxu0 }
 0x182   : > { %v546_v45 = vadd.f32 %v545_v44, %v471_v41  ;;  %v548_v46 = vmax.f32 %v544_v43, 0.0 }
 0x184   : > { %v549_v47 = vmax.f32 %v546_v45, 0.0 }
 0x186   : > { %v552_v48 = vcombine.low %v548_v46, %v549_v47  ;;  %v912_v49 = vcombine.low %v549_v47, %v549_v47 }
 0x188   : > { %554 = vst [vmem:[#allocation2 + $0x4] sm:$0xff] %v552_v48  ;;  %695 = vrot.lane.b32.xlu0 %v552_v48, %s922_s24  ;;  %678 = vrot.lane.b32.xlu1 %v552_v48, %s923_s25  ;;  %633 = vst [vmem:[#allocation3 + $0x88] sm:$0xf] %v552_v48 }
 0x189   : > { %634 = vst [vmem:[#allocation3 + $0x40] sm:$0xf] %v912_v49 }
 0x18c   : > { %659 = vrot.lane.b32.xlu0 %v552_v48, %s924_s26  ;;  %640 = vrot.lane.b32.xlu1 %v552_v48, %s925_s27 }
 0x18f   : > { %v611_v50 = vld [vmem:[#allocation2 + $0x8] sm:$0xf]  ;;  %v610_v51 = vld [vmem:[#allocation2] sm:$0xff] }
 0x190   : > { %619 = vrot.lane.b32.xlu1 %v611_v50, %s926_s28  ;;  %615 = vrot.lane.b32.xlu0 %v610_v51, %s926_s28  ;;  %v592_v52 = vld [vmem:[#allocation2 + $0x8] sm:$0xf]  ;;  %v614_v53 = vcombine.high %v610_v51, %v610_v51  ;;  %v719_v37 = vld [vmem:[#allocation3 + $0x40] sm:$0xff] }
 0x191   : > { %v575_v54 = vld [vmem:[#allocation2 + $0x8] sm:$0xf] }
 0x192   : > { %v556_v56 = vld [vmem:[#allocation2 + $0x8] sm:$0xf] }
 0x194   : > { %600 = vrot.lane.b32.xlu0 %v592_v52, %s927_s29  ;;  %596 = vrot.lane.b32.xlu1 %v610_v51, %s927_s29 }
 0x198   : > { %617 = vrot.lane.b32.xlu0 %v614_v53, %s926_s28  ;;  %583 = vrot.lane.b32.xlu1 %v575_v54, %s928_s30 }
 0x19c   : > { %697 = vrot.lane.b32.xlu1 %v912_v49, %s922_s24  ;;  %581 = vrot.lane.b32.xlu0 %v614_v53, %s928_s30 }
 0x1a0   : > { %680 = vrot.lane.b32.xlu1 %v912_v49, %s923_s25  ;;  %562 = vrot.lane.b32.xlu0 %v614_v53, %s929_s6 }
 0x1a4   : > { %661 = vrot.lane.b32.xlu1 %v912_v49, %s924_s26  ;;  %579 = vrot.lane.b32.xlu0 %v610_v51, %s928_s30 }
 0x1a8   : > { %642 = vrot.lane.b32.xlu1 %v912_v49, %s925_s27  ;;  %731 = vperm.xlu0 %908, %v728_v55  }
 0x1ac   : > { %598 = vrot.lane.b32.xlu1 %v614_v53, %s927_s29 }
 0x1b0   : > { %564 = vrot.lane.b32.xlu1 %v556_v56, %s929_s6 }
 0x1b4   : > { %560 = vrot.lane.b32.xlu1 %v610_v51, %s929_s6 }
 0x1fa   : > { %v679_v61 = vpop.permute.xlu1 %678  ;;  %v696_v62 = vpop.permute.xlu0 %695 }
 0x1fe   : > { %v641_v63 = vpop.permute.xlu1 %640  ;;  %v660_v0 = vpop.permute.xlu0 %659 }
 0x202   : > { %v620_v2 = vpop.permute.xlu1 %619  ;;  %v616_v4 = vpop.permute.xlu0 %615 }
 0x206   : > { %v597_v5 = vpop.permute.xlu1 %596  ;;  %v601_v6 = vpop.permute.xlu0 %600 }
 0x20a   : > { %v584_v7 = vpop.permute.xlu1 %583  ;;  %v618_v8 = vpop.permute.xlu0 %617 }
 0x20b   : > { %v621_v9 = vsel %vm355_vm8, %v616_v4, %v618_v8  ;;  %v622_v10 = vsel %vm355_vm8, %v618_v8, %v620_v2 }
 0x20c   : > { %v625_v11 = vsel %vm1027_vm3, %v621_v9, 0.0  ;;  %v626_v12 = vsel %vm1023_vm2, %v622_v10, 0.0 }
 0x20d   : > { %627 = vst [vmem:[#allocation3 + $0x70] sm:$0xf] %v625_v11  ;;  %628 = vst [vmem:[#allocation3 + $0x80] sm:$0xf] %v626_v12 }
 0x20e   : > { %v698_v13 = vpop.permute.xlu1 %697  ;;  %v582_v14 = vpop.permute.xlu0 %581 }
 0x20f   : > { %v701_v15 = vsel %vm439_vm4, %v696_v62, %v698_v13  ;;  %v702_v16 = vsel %vm439_vm4, %v698_v13, %v700_v59  ;;  %v586_v17 = vsel %vm313_vm10, %v582_v14, %v584_v7 }
 0x210   : > { %v705_v18 = vsel %vm1037_vm5, %v701_v15, 0.0  ;;  %v706_v19 = vsel %vm1041_vm6, %v702_v16, 0.0  ;;  %590 = vst [vmem:[#allocation3 + $0x58] sm:$0xf] %v586_v17 }
 0x211   : > { %707 = vst [vmem:[#allocation3 + $0x68] sm:$0xf] %v705_v18  ;;  %708 = vst [vmem:[#allocation3 + $0x60] sm:$0xf] %v706_v19 }
 0x212   : > { %v681_v20 = vpop.permute.xlu1 %680  ;;  %v563_v21 = vpop.permute.xlu0 %562 }
 0x213   : > { %v684_v22 = vsel %vm421_vm0, %v679_v61, %v681_v20  ;;  %v685_v23 = vsel %vm421_vm0, %v681_v20, %v683_v57  ;;  %v718_v57 = vld [vmem:[#allocation3 + $0x88] sm:$0xff] }
 0x214   : > { %688 = vst [vmem:[#allocation3 + $0x30] sm:$0xf] %v684_v22  ;;  %689 = vst [vmem:[#allocation3 + $0x18] sm:$0xf] %v685_v23  ;;  %v717_v59 = vld [vmem:[#allocation3 + $0x80] sm:$0xff]  ;;  %v716_v28 = vld [vmem:[#allocation3 + $0x70] sm:$0xff] }
 0x216   : > { %v662_v24 = vpop.permute.xlu1 %661  ;;  %v580_v25 = vpop.permute.xlu0 %579 }
 0x217   : > { %v665_v26 = vsel %vm401_vm1, %v660_v0, %v662_v24  ;;  %v666_v27 = vsel %vm401_vm1, %v662_v24, %v664_v58  ;;  %v585_v30 = vsel %vm313_vm10, %v580_v25, %v582_v14  ;;  %v713_v62 = vld [vmem:[#allocation3 + $0x58] sm:$0xff] }
 0x218   : > { %v669_v31 = vsel %vm1027_vm3, %v665_v26, 0.0  ;;  %v670_v32 = vsel %vm1023_vm2, %v666_v27, 0.0  ;;  %589 = vst [vmem:[#allocation3 + $0x78] sm:$0xf] %v585_v30  ;;  %v727_v33 = vld [vmem:[#allocation3 + $0x60] sm:$0xff]  ;;  %v726_v34 = vld [vmem:[#allocation3 + $0x68] sm:$0xff] }
 0x219   : > { %671 = vst [vmem:[#allocation3 + $0x10] sm:$0xf] %v669_v31  ;;  %672 = vst [vmem:[#allocation3 + $0x48] sm:$0xf] %v670_v32  ;;  %751 = vmatprep.subr.mxu1 %v727_v33 }
 0x21a   : > { %v643_v35 = vpop.permute.xlu1 %642  ;;  %752 = vmatpush1.msra.mxu1 %v726_v34 }
 0x21b   : > { %v646_v38 = vsel %vm381_vm7, %v641_v63, %v643_v35  ;;  %v647_v39 = vsel %vm381_vm7, %v643_v35, %v645_v60  ;;  %v725_v40 = vld [vmem:[#allocation3 + $0x18] sm:$0xff]  ;;  %v724_v41 = vld [vmem:[#allocation3 + $0x30] sm:$0xff] }
 0x21c   : > { %v650_v42 = vsel %vm1037_vm5, %v646_v38, 0.0  ;;  %v651_v43 = vsel %vm1041_vm6, %v647_v39, 0.0  ;;  %753 = vmatprep.subr.mxu1 %v725_v40 }
 0x21d   : > { %652 = vst [vmem:[#allocation3 + $0x50] sm:$0xf] %v650_v42  ;;  %653 = vst [vmem:[#allocation3 + $0x28] sm:$0xf] %v651_v43  ;;  %754 = vmatpush1.msra.mxu1 %v724_v41 }
 0x21e   : > { %v599_v44 = vpop.permute.xlu1 %598 }
 0x21f   : > { %v602_v45 = vsel %vm335_vm9, %v597_v5, %v599_v44  ;;  %v603_v46 = vsel %vm335_vm9, %v599_v44, %v601_v6  ;;  %v712_v63 = vld [vmem:[#allocation3 + $0x78] sm:$0xff] }
 0x220   : > { %v606_v47 = vsel %vm1037_vm5, %v602_v45, 0.0  ;;  %v607_v48 = vsel %vm1041_vm6, %v603_v46, 0.0  ;;  %v723_v49 = vld [vmem:[#allocation3 + $0x48] sm:$0xff]  ;;  %v722_v50 = vld [vmem:[#allocation3 + $0x10] sm:$0xff] }
 0x221   : > { %608 = vst [vmem:[#allocation3 + $0x20] sm:$0xf] %v606_v47  ;;  %609 = vst [vmem:[#allocation3 + $0x8] sm:$0xf] %v607_v48  ;;  %755 = vmatprep.subr.mxu1 %v723_v49 }
 0x222   : > { %v565_v51 = vpop.permute.xlu1 %564  ;;  %756 = vmatpush1.msra.mxu1 %v722_v50 }
 0x223   : > { %v567_v52 = vsel %vm293_vm11, %v563_v21, %v565_v51  ;;  %v732_v4 = vpop.permute.xlu0 %731 }
 0x224   : > { %v571_v53 = vsel %vm1023_vm2, %v567_v52, 0.0  ;;  %v721_v54 = vld [vmem:[#allocation3 + $0x28] sm:$0xff]  ;;  %v720_v55 = vld [vmem:[#allocation3 + $0x50] sm:$0xff] }
 0x225   : > { %573 = vst [vmem:[#allocation3 + $0x38] sm:$0xf] %v571_v53  ;;  %757 = vmatprep.subr.mxu1 %v721_v54 }
 0x226   : > { %v561_v36 = vpop.permute.xlu1 %560  ;;  %758 = vmatpush1.msra.mxu1 %v720_v55 }
 0x227   : > { %v566_v56 = vsel %vm293_vm11, %v561_v36, %v563_v21  ;;  %759 = vmatprep.subr.mxu1 %v719_v37 }
 0x228   : > { %v570_v58 = vsel %vm1027_vm3, %v566_v56, 0.0  ;;  %760 = vmatpush1.msra.mxu1 %v718_v57  ;;  %v715_v60 = vld [vmem:[#allocation3 + $0x8] sm:$0xff]  ;;  %v714_v61 = vld [vmem:[#allocation3 + $0x20] sm:$0xff] }
 0x229   : > { %572 = vst [vmem:[#allocation3] sm:$0xf] %v570_v58  ;;  %761 = vmatprep.subr.mxu1 %v717_v59 }
 0x22a   : > { %762 = vmatpush1.msra.mxu1 %v716_v28 }
 0x22b   : > { %763 = vmatprep.subr.mxu1 %v715_v60 }
 0x22c   : > { %764 = vmatpush1.msra.mxu1 %v714_v61  ;;  %v711_v0 = vld [vmem:[#allocation3 + $0x38] sm:$0xff] }
 0x22d   : > { %765 = vmatprep.subr.mxu1 %v713_v62 }
 0x22e   : > { %766 = vmatpush1.msra.mxu1 %v712_v63 }
 0x22f   : > { %767 = vmatprep.subr.mxu1 %v711_v0 }
 0x230   : > { %v710_v2 = vld [vmem:[#allocation3] sm:$0xff] }
 0x231   : > { %768 = vmatpush1.msra.mxu1 %v710_v2 }
 0x232   : > { %885 = vmatmul.mubr.msk.f32.vlgmr.msra.gmra.mxu1 %vm473_vm12, %v709_v29 }
 0x2f2   : > { %v803_v5 = vpop.f32.mrf.mxu1 }
 0x2f3   : > { %v804_v6 = vadd.f32 %v803_v5, %v732_v4 }
 0x2f4   : > { %v805_v7 = vpop.f32.mrf.mxu1 }
 0x2f5   : > { %v811_v8 = vadd.f32 %v804_v6, %v977_v1  ;;  %v806_v9 = vadd.f32 %v805_v7, %v732_v4 }
 0x2f7   : > { %v812_v10 = vadd.f32 %v806_v9, %v984_v3  ;;  %v813_v11 = vmax.f32 %v811_v8, 0.0 }
 0x2f9   : > { %v814_v12 = vmax.f32 %v812_v10, 0.0 }
 0x2fb   : > { %v817_v13 = vcombine.low %v813_v11, %v814_v12 }
 0x2fd   : > { %819 = vst [vmem:[%s224_s17] sm:$0xff] %v817_v13 }
 0x2fe PF: > { %s15_s18 = sadd.s32 1, %s919_s18  }
 0x2ff   : > { %p12_p4 = scmp.ge.s32.totalorder %s15_s18, 4  }
 0x301   :  { %14 = sbr.rel (!%p12_p4) target bundleno = 1 (0x1), region = 70 }

</bundles_post_ra>
